<compile_context>
chip_gen: v6e
topology: v6e:2x2x1
jax: 0.10.0
libtpu: 0.0.40
codegen_flags: <defaults>
</compile_context>

<pallas_src>
import functools

import jax
import jax.numpy as jnp
from jax.experimental import pallas as pl
from jax.experimental.pallas import tpu as pltpu


def _round_up(x, m):
    return (x + m - 1) // m * m


# --------------------------------------------------------------------------
# One-time (hoisted) packing helpers
# --------------------------------------------------------------------------
def prepare_vae_params(params, in_dims, hidden_dim, out_dim):
    """Pack model parameters into MXU-friendly slabs.  Run ONCE at init."""
    # fc_list -> single block weight: rows [w_0; w_1; ...; b_0; b_1; ...].
    w_fc = jnp.concatenate(
        [w for (w, _) in params["fc"]]
        + [jnp.stack([b for (_, b) in params["fc"]], axis=0)],
        axis=0,
    ).astype(jnp.float32)                                   # (sum_in + T, hidden)

    # GraphConv weights: mean/log_stddev heads column-concatenated, then the
    # three layers [w_k ; b_k] sublane-stacked (each block padded to 8 rows).
    gcn_width = max(hidden_dim, 2 * out_dim)
    blk_rows = _round_up(hidden_dim + 1, 8)
    w_ml = jnp.concatenate([params["gcn_mean"][0], params["gcn_logstd"][0]], axis=1)
    b_ml = jnp.concatenate([params["gcn_mean"][1], params["gcn_logstd"][1]], axis=0)
    blocks = []
    for w, b in (params["gcn1"], params["gcn2"], (w_ml, b_ml)):
        blk = jnp.concatenate([w, b[None, :]], axis=0)       # (hidden+1, width_k)
        blk = jnp.pad(blk, ((0, blk_rows - blk.shape[0]),
                            (0, gcn_width - blk.shape[1])))
        blocks.append(blk)
    w_gcn = jnp.concatenate(blocks, axis=0).astype(jnp.float32)  # (3*blk_rows, W)

    return {"w_fc": w_fc, "w_gcn": w_gcn, "blk_rows": blk_rows,
            "gcn_width": gcn_width}


def prepare_graph(adjM):
    """Per-graph prep (hoisted): [A_hat_norm | adjM] lane-concatenated.

    A_hat_norm = D^-1/2 (A + I) D^-1/2 (DGL GraphConv norm='both' with
    self-loops added to the graph)."""
    n = adjM.shape[0]
    a_hat = adjM + jnp.eye(n, dtype=adjM.dtype)
    deg = jnp.sum(a_hat, axis=1)
    dinv = 1.0 / jnp.sqrt(jnp.maximum(deg, 1.0))
    a_norm = a_hat * dinv[:, None] * dinv[None, :]
    return jnp.concatenate([a_norm, adjM], axis=1).astype(jnp.float32)  # (N, 2N)


def pack_features(features_list, in_dims):
    """Per-graph prep (hoisted): block-layout features + per-type bias columns.

    Row i of node type t carries its features in columns [off_t : off_t+d_t],
    a 1.0 in column sum_in + t (multiplies the bias row of w_fc), zeros
    elsewhere.  Rows are stacked in node-type order (== torch.cat(h, 0))."""
    num_types = len(in_dims)
    sum_in = sum(in_dims)
    rows, off = [], 0
    for t, f in enumerate(features_list):
        d = in_dims[t]
        onehot = jnp.zeros((f.shape[0], num_types), jnp.float32).at[:, t].set(1.0)
        rows.append(jnp.concatenate([
            jnp.zeros((f.shape[0], off), jnp.float32),
            f.astype(jnp.float32),
            jnp.zeros((f.shape[0], sum_in - off - d), jnp.float32),
            onehot], axis=1))
        off += d
    return jnp.concatenate(rows, axis=0)          # (N, sum_in + num_types)


# --------------------------------------------------------------------------
# The fused kernel
# --------------------------------------------------------------------------
def _build_kernel(n_total, hidden, out_dim, blk_rows, out_w):
    def kernel(graph_ref, noise_ref, x_ref, wfc_ref, wgcn_ref, out_ref):
        graph = graph_ref[...]
        a = graph[:, :n_total]                    # A_hat_norm (feeds the MXU)
        adjm = graph[:, n_total:2 * n_total]      # raw adjacency (elementwise)

        # ---- all per-node-type Linears as ONE matmul (bias folded in).
        gh = jnp.dot(x_ref[...], wfc_ref[...],
                     preferred_element_type=jnp.float32)        # (N, hidden)

        def gcn(x, k, width):
            # GraphConv (norm='both', activation=F.relu):
            #   relu(A_hat_norm @ (x @ W) + b)
            blk = wgcn_ref[k * blk_rows:(k + 1) * blk_rows, :]
            w = blk[:hidden, :width]
            b = blk[hidden:hidden + 1, :width]
            xw = jnp.dot(x, w, preferred_element_type=jnp.float32)
            y = jnp.dot(a, xw, preferred_element_type=jnp.float32) + b
            return jnp.maximum(y, 0.0)

        h1 = gcn(gh, 0, hidden)
        h2 = gcn(h1, 1, hidden)
        # mean / log_stddev heads share h2: one matmul on the column-concat
        # weights, split along lanes.  (ReLU kept: reference uses it on both.)
        ml = gcn(h2, 2, 2 * out_dim)              # (N, 2*out_dim)
        mean = ml[:, :out_dim]
        log_stddev = ml[:, out_dim:]

        # ---- reparameterized sample
        std = jnp.exp(log_stddev)                 # std*std == exp(2*log_stddev)
        z = noise_ref[...] * std + mean

        # ---- decode: adj_pred = triu(sigmoid(z @ z.T), diagonal=1)
        s = jax.lax.dot_general(z, z, (((1,), (1,)), ((), ())),
                                preferred_element_type=jnp.float32)
        p = jax.nn.sigmoid(s)
        row = jax.lax.broadcasted_iota(jnp.int32, (n_total, n_total), 0)
        col = jax.lax.broadcasted_iota(jnp.int32, (n_total, n_total), 1)
        adj_pred = jnp.where(col > row, p, 0.0)

        # ---- VAELoss (single pass == the reference's 5 identical terms / 5)
        # adj_label = adjM + I built in-register; PyTorch BCE clamps log at -100.
        label = adjm + jnp.where(col == row, 1.0, 0.0)
        logp = jnp.maximum(jnp.log(adj_pred), -100.0)
        log1mp = jnp.maximum(jnp.log(1.0 - adj_pred), -100.0)
        bce = -(label * logp + (1.0 - label) * log1mp)
        similar = jnp.sum(bce, keepdims=True) * (1.0 / float(n_total * n_total))
        # 0.5 / N * mean_over_rows(sum_over_cols(g)) == sum(g) * 0.5 / N^2
        g = 1.0 + 2.0 * log_stddev - mean * mean - std * std
        kl = jnp.sum(g, keepdims=True) * (0.5 / float(n_total * n_total))
        loss = similar + kl                        # (1, 1)

        # ---- single lane-dense output slab: [adj_pred | z | loss broadcast]
        pad = out_w - n_total - out_dim
        out_ref[...] = jnp.concatenate(
            [adj_pred, z, jnp.broadcast_to(loss, (n_total, pad))], axis=1)

    return kernel


# --------------------------------------------------------------------------
# Forward wrapper
# --------------------------------------------------------------------------
@functools.partial(jax.jit, static_argnames=("hidden_dim", "out_dim", "blk_rows"))
def vae_forward(graph_slab, x_packed, noise, w_fc, w_gcn, *,
                hidden_dim, out_dim, blk_rows):
    n_total = graph_slab.shape[0]
    out_w = max(128, _round_up(n_total + out_dim + 1, 128))
    kernel = _build_kernel(n_total, hidden_dim, out_dim, blk_rows, out_w)

    operands = (graph_slab, noise, x_packed, w_fc, w_gcn)
    in_bytes = sum(int(o.size) * 4 for o in operands)
    flops = (2 * n_total * int(x_packed.shape[1]) * hidden_dim
             + 2 * 2 * (n_total * hidden_dim * hidden_dim
                        + n_total * n_total * hidden_dim)
             + 2 * (n_total * hidden_dim * 2 * out_dim
                    + n_total * n_total * 2 * out_dim)
             + 2 * n_total * n_total * out_dim)
    cost = pl.CostEstimate(
        flops=int(flops),
        transcendentals=int(3 * n_total * n_total + n_total * out_dim),
        bytes_accessed=int(in_bytes + n_total * out_w * 4))

    out = pl.pallas_call(
        kernel,
        in_specs=[pl.BlockSpec(memory_space=pltpu.MemorySpace.VMEM)
                  for _ in operands],
        out_specs=pl.BlockSpec(memory_space=pltpu.MemorySpace.VMEM),
        out_shape=jax.ShapeDtypeStruct((n_total, out_w), jnp.float32),
        cost_estimate=cost,
    )(*operands)

    adj_pred = out[:, :n_total]
    sampled_z = out[:, n_total:n_total + out_dim]
    loss = out[0, n_total + out_dim]
    return adj_pred, sampled_z, loss


# --------------------------------------------------------------------------
# Example / smoke test
# --------------------------------------------------------------------------
if __name__ == "__main__":
    key = jax.random.PRNGKey(0)
    in_dims = [10, 12]            # heterogeneous node-type feature dims
    node_counts = [8, 8]
    hidden_dim = 32
    out_dim = 16
    N = sum(node_counts)

    keys = jax.random.split(key, 12)

    features_list = [
        jax.random.normal(keys[0], (node_counts[0], in_dims[0]), jnp.float32),
        jax.random.normal(keys[1], (node_counts[1], in_dims[1]), jnp.float32),
    ]

    params = {"fc": []}
    for i, d in enumerate(in_dims):
        # kaiming-style scale; weight stored as (in, hidden) so x @ w == x @ W.T
        w = jax.random.normal(keys[2 + i], (d, hidden_dim), jnp.float32) * (2.0 / d) ** 0.5
        b = jnp.zeros((hidden_dim,), jnp.float32)
        params["fc"].append((w, b))

    def gcn_params(k, fin, fout):
        w = jax.random.normal(k, (fin, fout), jnp.float32) * (1.0 / fin) ** 0.5
        b = jnp.zeros((fout,), jnp.float32)
        return (w, b)

    params["gcn1"] = gcn_params(keys[4], hidden_dim, hidden_dim)
    params["gcn2"] = gcn_params(keys[5], hidden_dim, hidden_dim)
    params["gcn_mean"] = gcn_params(keys[6], hidden_dim, out_dim)
    params["gcn_logstd"] = gcn_params(keys[7], hidden_dim, out_dim)

    # random symmetric 0/1 adjacency (no self loops) standing in for adjM / g
    upper = (jax.random.uniform(keys[8], (N, N)) < 0.3).astype(jnp.float32)
    upper = jnp.triu(upper, k=1)
    adjM = upper + upper.T

    # torch.randn gauss_noise -> deterministic JAX noise passed in explicitly
    noise = jax.random.normal(keys[9], (N, out_dim), jnp.float32)

    # One-time packing (hoisted out of the forward / training step).
    packed = prepare_vae_params(params, in_dims, hidden_dim, out_dim)
    graph_slab = prepare_graph(adjM)
    x_packed = pack_features(features_list, in_dims)

    adj_pred, sampled_z, loss = vae_forward(
        graph_slab, x_packed, noise, packed["w_fc"], packed["w_gcn"],
        hidden_dim=hidden_dim, out_dim=out_dim, blk_rows=packed["blk_rows"])
    jax.block_until_ready((adj_pred, sampled_z, loss))

    assert adj_pred.shape == (N, N) and sampled_z.shape == (N, out_dim)
    assert bool(jnp.isfinite(loss))
    print("KERNEL_OK")
</pallas_src>

<mosaic_0001>
module attributes {stable_mosaic.version = 11 : i64} {
  func.func @kernel(%arg0: memref<16x32xf32, #tpu.memory_space<vmem>>, %arg1: memref<16x16xf32, #tpu.memory_space<vmem>>, %arg2: memref<16x24xf32, #tpu.memory_space<vmem>>, %arg3: memref<24x32xf32, #tpu.memory_space<vmem>>, %arg4: memref<120x32xf32, #tpu.memory_space<vmem>>, %arg5: memref<16x128xf32, #tpu.memory_space<vmem>>) attributes {dimension_semantics = [], scalar_prefetch = 0 : i64, scratch_operands = 0 : i64, tpu.core_type = #tpu.core_type<tc>} {
    %c0 = arith.constant 0 : index
    %c0_0 = arith.constant 0 : index
    %0 = vector.load %arg0[%c0, %c0_0] : memref<16x32xf32, #tpu.memory_space<vmem>>, vector<16x32xf32>
    %1 = vector.extract_strided_slice %0 {offsets = [0, 0], sizes = [16, 16], strides = [1, 1]} : vector<16x32xf32> to vector<16x16xf32>
    %2 = vector.extract_strided_slice %0 {offsets = [0, 16], sizes = [16, 16], strides = [1, 1]} : vector<16x32xf32> to vector<16x16xf32>
    %c0_1 = arith.constant 0 : index
    %c0_2 = arith.constant 0 : index
    %3 = vector.load %arg2[%c0_1, %c0_2] : memref<16x24xf32, #tpu.memory_space<vmem>>, vector<16x24xf32>
    %c0_3 = arith.constant 0 : index
    %c0_4 = arith.constant 0 : index
    %4 = vector.load %arg3[%c0_3, %c0_4] : memref<24x32xf32, #tpu.memory_space<vmem>>, vector<24x32xf32>
    %cst = arith.constant dense<0.000000e+00> : vector<16x32xf32>
    %5 = tpu.matmul %3, %4, %cst {dimension_numbers = #tpu.dot_dimension_numbers<[1], [0], [0], [1], [0, 0, 1, 1], [], []>} : vector<16x24xf32>, vector<24x32xf32>, vector<16x32xf32> -> vector<16x32xf32>
    %c0_5 = arith.constant 0 : index
    %c0_6 = arith.constant 0 : index
    %6 = vector.load %arg4[%c0_5, %c0_6] : memref<120x32xf32, #tpu.memory_space<vmem>>, vector<40x32xf32>
    %7 = vector.extract_strided_slice %6 {offsets = [0, 0], sizes = [32, 32], strides = [1, 1]} : vector<40x32xf32> to vector<32x32xf32>
    %8 = vector.extract_strided_slice %6 {offsets = [32, 0], sizes = [1, 32], strides = [1, 1]} : vector<40x32xf32> to vector<1x32xf32>
    %cst_7 = arith.constant dense<0.000000e+00> : vector<16x32xf32>
    %9 = tpu.matmul %5, %7, %cst_7 {dimension_numbers = #tpu.dot_dimension_numbers<[1], [0], [0], [1], [0, 0, 1, 1], [], []>} : vector<16x32xf32>, vector<32x32xf32>, vector<16x32xf32> -> vector<16x32xf32>
    %cst_8 = arith.constant dense<0.000000e+00> : vector<16x32xf32>
    %10 = tpu.matmul %1, %9, %cst_8 {dimension_numbers = #tpu.dot_dimension_numbers<[1], [0], [0], [1], [0, 0, 1, 1], [], []>} : vector<16x16xf32>, vector<16x32xf32>, vector<16x32xf32> -> vector<16x32xf32>
    %11 = vector.broadcast %8 : vector<1x32xf32> to vector<16x32xf32>
    %12 = arith.addf %10, %11 : vector<16x32xf32>
    %cst_9 = arith.constant 0.000000e+00 : f32
    %13 = vector.broadcast %cst_9 : f32 to vector<16x32xf32>
    %14 = arith.maximumf %12, %13 : vector<16x32xf32>
    %c40 = arith.constant 40 : index
    %c0_10 = arith.constant 0 : index
    %15 = vector.load %arg4[%c40, %c0_10] : memref<120x32xf32, #tpu.memory_space<vmem>>, vector<40x32xf32>
    %16 = vector.extract_strided_slice %15 {offsets = [0, 0], sizes = [32, 32], strides = [1, 1]} : vector<40x32xf32> to vector<32x32xf32>
    %17 = vector.extract_strided_slice %15 {offsets = [32, 0], sizes = [1, 32], strides = [1, 1]} : vector<40x32xf32> to vector<1x32xf32>
    %cst_11 = arith.constant dense<0.000000e+00> : vector<16x32xf32>
    %18 = tpu.matmul %14, %16, %cst_11 {dimension_numbers = #tpu.dot_dimension_numbers<[1], [0], [0], [1], [0, 0, 1, 1], [], []>} : vector<16x32xf32>, vector<32x32xf32>, vector<16x32xf32> -> vector<16x32xf32>
    %cst_12 = arith.constant dense<0.000000e+00> : vector<16x32xf32>
    %19 = tpu.matmul %1, %18, %cst_12 {dimension_numbers = #tpu.dot_dimension_numbers<[1], [0], [0], [1], [0, 0, 1, 1], [], []>} : vector<16x16xf32>, vector<16x32xf32>, vector<16x32xf32> -> vector<16x32xf32>
    %20 = vector.broadcast %17 : vector<1x32xf32> to vector<16x32xf32>
    %21 = arith.addf %19, %20 : vector<16x32xf32>
    %cst_13 = arith.constant 0.000000e+00 : f32
    %22 = vector.broadcast %cst_13 : f32 to vector<16x32xf32>
    %23 = arith.maximumf %21, %22 : vector<16x32xf32>
    %c80 = arith.constant 80 : index
    %c0_14 = arith.constant 0 : index
    %24 = vector.load %arg4[%c80, %c0_14] : memref<120x32xf32, #tpu.memory_space<vmem>>, vector<40x32xf32>
    %25 = vector.extract_strided_slice %24 {offsets = [0, 0], sizes = [32, 32], strides = [1, 1]} : vector<40x32xf32> to vector<32x32xf32>
    %26 = vector.extract_strided_slice %24 {offsets = [32, 0], sizes = [1, 32], strides = [1, 1]} : vector<40x32xf32> to vector<1x32xf32>
    %cst_15 = arith.constant dense<0.000000e+00> : vector<16x32xf32>
    %27 = tpu.matmul %23, %25, %cst_15 {dimension_numbers = #tpu.dot_dimension_numbers<[1], [0], [0], [1], [0, 0, 1, 1], [], []>} : vector<16x32xf32>, vector<32x32xf32>, vector<16x32xf32> -> vector<16x32xf32>
    %cst_16 = arith.constant dense<0.000000e+00> : vector<16x32xf32>
    %28 = tpu.matmul %1, %27, %cst_16 {dimension_numbers = #tpu.dot_dimension_numbers<[1], [0], [0], [1], [0, 0, 1, 1], [], []>} : vector<16x16xf32>, vector<16x32xf32>, vector<16x32xf32> -> vector<16x32xf32>
    %29 = vector.broadcast %26 : vector<1x32xf32> to vector<16x32xf32>
    %30 = arith.addf %28, %29 : vector<16x32xf32>
    %cst_17 = arith.constant 0.000000e+00 : f32
    %31 = vector.broadcast %cst_17 : f32 to vector<16x32xf32>
    %32 = arith.maximumf %30, %31 : vector<16x32xf32>
    %33 = vector.extract_strided_slice %32 {offsets = [0, 0], sizes = [16, 16], strides = [1, 1]} : vector<16x32xf32> to vector<16x16xf32>
    %34 = vector.extract_strided_slice %32 {offsets = [0, 16], sizes = [16, 16], strides = [1, 1]} : vector<16x32xf32> to vector<16x16xf32>
    %35 = math.exp %34 : vector<16x16xf32>
    %c0_18 = arith.constant 0 : index
    %c0_19 = arith.constant 0 : index
    %36 = vector.load %arg1[%c0_18, %c0_19] : memref<16x16xf32, #tpu.memory_space<vmem>>, vector<16x16xf32>
    %37 = arith.mulf %36, %35 : vector<16x16xf32>
    %38 = arith.addf %37, %33 : vector<16x16xf32>
    %cst_20 = arith.constant dense<0.000000e+00> : vector<16x16xf32>
    %39 = tpu.matmul %38, %38, %cst_20 {dimension_numbers = #tpu.dot_dimension_numbers<[1], [1], [0], [0], [0, 0, 1, 0], [], []>} : vector<16x16xf32>, vector<16x16xf32>, vector<16x16xf32> -> vector<16x16xf32>
    %40 = arith.negf %39 : vector<16x16xf32>
    %41 = math.exp %40 : vector<16x16xf32>
    %cst_21 = arith.constant 1.000000e+00 : f32
    %42 = vector.broadcast %cst_21 : f32 to vector<16x16xf32>
    %43 = arith.addf %42, %41 : vector<16x16xf32>
    %44 = arith.divf %42, %43 : vector<16x16xf32>
    %45 = tpu.iota {dimensions = array<i32: 0>} : vector<16x16xi32>
    %46 = tpu.iota {dimensions = array<i32: 1>} : vector<16x16xi32>
    %47 = arith.cmpi sgt, %46, %45 : vector<16x16xi32>
    %cst_22 = arith.constant 0.000000e+00 : f32
    %48 = vector.broadcast %cst_22 : f32 to vector<16x16xf32>
    %49 = arith.select %47, %44, %48 : vector<16x16xi1>, vector<16x16xf32>
    %50 = arith.cmpi eq, %46, %45 : vector<16x16xi32>
    %cst_23 = arith.constant 1.000000e+00 : f32
    %cst_24 = arith.constant 0.000000e+00 : f32
    %51 = vector.broadcast %cst_23 : f32 to vector<16x16xf32>
    %52 = vector.broadcast %cst_24 : f32 to vector<16x16xf32>
    %53 = arith.select %50, %51, %52 : vector<16x16xi1>, vector<16x16xf32>
    %54 = arith.addf %2, %53 : vector<16x16xf32>
    %55 = math.log %49 : vector<16x16xf32>
    %cst_25 = arith.constant -1.000000e+02 : f32
    %56 = vector.broadcast %cst_25 : f32 to vector<16x16xf32>
    %57 = arith.maximumf %55, %56 : vector<16x16xf32>
    %cst_26 = arith.constant 1.000000e+00 : f32
    %58 = vector.broadcast %cst_26 : f32 to vector<16x16xf32>
    %59 = arith.subf %58, %49 : vector<16x16xf32>
    %60 = math.log %59 : vector<16x16xf32>
    %cst_27 = arith.constant -1.000000e+02 : f32
    %61 = vector.broadcast %cst_27 : f32 to vector<16x16xf32>
    %62 = arith.maximumf %60, %61 : vector<16x16xf32>
    %63 = arith.mulf %54, %57 : vector<16x16xf32>
    %cst_28 = arith.constant 1.000000e+00 : f32
    %64 = vector.broadcast %cst_28 : f32 to vector<16x16xf32>
    %65 = arith.subf %64, %54 : vector<16x16xf32>
    %66 = arith.mulf %65, %62 : vector<16x16xf32>
    %67 = arith.addf %63, %66 : vector<16x16xf32>
    %cst_29 = arith.constant 0.000000e+00 : f32
    %68 = vector.broadcast %cst_29 : f32 to vector<16x16xf32>
    %69 = arith.subf %68, %67 : vector<16x16xf32>
    %70 = vector.shape_cast %69 : vector<16x16xf32> to vector<1x16x16xf32>
    %cst_30 = arith.constant dense<0.000000e+00> : vector<1xf32>
    %71 = vector.multi_reduction <add>, %70, %cst_30 [1, 2] : vector<1x16x16xf32> to vector<1xf32>
    %72 = vector.shape_cast %71 : vector<1xf32> to vector<1x1x1xf32>
    %73 = vector.extract %72[0, 0, 0] : f32 from vector<1x1x1xf32>
    %74 = vector.broadcast %73 : f32 to vector<1x1xf32>
    %cst_31 = arith.constant 3.906250e-03 : f32
    %75 = vector.broadcast %cst_31 : f32 to vector<1x1xf32>
    %76 = arith.mulf %74, %75 : vector<1x1xf32>
    %cst_32 = arith.constant 2.000000e+00 : f32
    %77 = vector.broadcast %cst_32 : f32 to vector<16x16xf32>
    %78 = arith.mulf %77, %34 : vector<16x16xf32>
    %cst_33 = arith.constant 1.000000e+00 : f32
    %79 = vector.broadcast %cst_33 : f32 to vector<16x16xf32>
    %80 = arith.addf %79, %78 : vector<16x16xf32>
    %81 = arith.mulf %33, %33 : vector<16x16xf32>
    %82 = arith.subf %80, %81 : vector<16x16xf32>
    %83 = arith.mulf %35, %35 : vector<16x16xf32>
    %84 = arith.subf %82, %83 : vector<16x16xf32>
    %85 = vector.shape_cast %84 : vector<16x16xf32> to vector<1x16x16xf32>
    %cst_34 = arith.constant dense<0.000000e+00> : vector<1xf32>
    %86 = vector.multi_reduction <add>, %85, %cst_34 [1, 2] : vector<1x16x16xf32> to vector<1xf32>
    %87 = vector.shape_cast %86 : vector<1xf32> to vector<1x1x1xf32>
    %88 = vector.extract %87[0, 0, 0] : f32 from vector<1x1x1xf32>
    %89 = vector.broadcast %88 : f32 to vector<1x1xf32>
    %cst_35 = arith.constant 0.001953125 : f32
    %90 = vector.broadcast %cst_35 : f32 to vector<1x1xf32>
    %91 = arith.mulf %89, %90 : vector<1x1xf32>
    %92 = arith.addf %76, %91 : vector<1x1xf32>
    %93 = vector.shape_cast %92 : vector<1x1xf32> to vector<1x1xf32>
    %94 = vector.broadcast %93 : vector<1x1xf32> to vector<16x96xf32>
    %95 = tpu.concatenate %49, %38, %94 in 1 : vector<16x16xf32>, vector<16x16xf32>, vector<16x96xf32> -> vector<16x128xf32>
    %c0_36 = arith.constant 0 : index
    %c0_37 = arith.constant 0 : index
    %96 = vector.load %arg5[%c0_36, %c0_37] : memref<16x128xf32, #tpu.memory_space<vmem>>, vector<16x128xf32>
    tpu.vector_store %arg5[%c0_36, %c0_37], %95 {strides = array<i32>} : memref<16x128xf32, #tpu.memory_space<vmem>>, vector<16x128xf32>,
    return
  }
}

</mosaic_0001>

<bundles_post_ra>
// kernel: vae_forward.1
= control target key start
LH: loop header
LB: loop body
LE: loop exit
PB: predicated region body
PF: predicated region fallthrough
CT: control target
= control target key end

     0   :  { %vm27_vm0 = vcmask 195584   ;;  %vm114_vm1 = vcmask 261120   ;;  %vm200_vm2 = vcmask 130048   ;;  %v196_v19 = vlaneseq  ;;  %s1036_s8 = smov 112   ;;  %s1257_s3 = inlined_call_operand.vmem [shape: f32[24,32], index: 3, kind: input, shape index: {}]   ;;  %s1258_s2 = inlined_call_operand.vmem [shape: f32[16,24], index: 2, kind: input, shape index: {}]   ;;  %s1259_s4 = inlined_call_operand.vmem [shape: f32[120,32], index: 4, kind: input, shape index: {}]   ;;  %s1260_s0 = inlined_call_operand.vmem [shape: f32[16,32], index: 0, kind: input, shape index: {}]   ;;  %s1261_s1 = inlined_call_operand.vmem [shape: f32[16,16], index: 1, kind: input, shape index: {}]   ;;  %s1262_s5 = inlined_call_operand.vmem [shape: f32[16,128], index: 5, kind: output, shape index: {}]  }
   0x1   :  { %v26_v0 = vld [vmem:[%s1257_s3 + $0x10] sm:$0xff]  ;;  %v25_v1 = vld [vmem:[%s1257_s3 + $0x8] sm:$0xff]  ;;  %v22_v2 = vld [vmem:[%s1258_s2] sm:$0xff] }
   0x2   :  { %932 = vmatprep.subr.mxu0 %v26_v0  ;;  %v112_v3 = vld [vmem:[%s1259_s4 + $0x18] sm:$0xff]  ;;  %v24_v4 = vld [vmem:[%s1257_s3] sm:$0xff]  ;;  %938 = vmatprep.mubr.msk.f32.mxu0 %vm27_vm0, %v22_v2  ;;  %v111_v5 = vld [vmem:[%s1259_s4 + $0x10] sm:$0xff]  ;;  %v1129_v20 = vshrl.u32 %v196_v19, 7 }
   0x3   :  { %933 = vmatpush3.msra.mxu0 %v26_v0  ;;  %941 = vmatprep.subr.mxu1 %v112_v3  ;;  %v23_v6 = vld [vmem:[%s1258_s2 + $0x8] sm:$0xff]  ;;  %v109_v8 = vld [vmem:[%s1259_s4] sm:$0xff]  ;;  %v286_v16 = vld [vmem:[%s1259_s4 + $0x38] sm:$0xff] }
   0x4   :  { %934 = vmatprep.subr.mxu0 %v25_v1  ;;  %942 = vmatpush3.msra.mxu1 %v112_v3  ;;  %v110_v7 = vld [vmem:[%s1259_s4 + $0x8] sm:$0xff]  ;;  %v1103_v11 = vld [vmem:[%s1260_s0] sm:$0xff]  ;;  %v285_v17 = vld [vmem:[%s1259_s4 + $0x30] sm:$0xff]  ;;  %v198_v21 = vsub.s32 0, %v1129_v20  ;;  %v731_v2 = vadd.s32 8, %v1129_v20  ;;  %v733_v3 = vand.u32 127, %v196_v19 }
   0x5   :  { %935 = vmatpush3.msra.mxu0 %v25_v1  ;;  %943 = vmatprep.subr.mxu1 %v111_v5  ;;  %v1110_v14 = vld [vmem:[%s1260_s0 + $0x8] sm:$0xff]  ;;  %v287_v15 = vld [vmem:[%s1259_s4 + $0x40] sm:$0xff]  ;;  %v452_v34 = vld [vmem:[%s1259_s4 + $0x58] sm:$0xff] }
   0x6   :  { %936 = vmatprep.subr.mxu0 %v24_v4  ;;  %944 = vmatpush3.msra.mxu1 %v111_v5  ;;  %v284_v18 = vld [vmem:[%s1259_s4 + $0x28] sm:$0xff]  ;;  %v113_v22 = vld [vmem:[%s1259_s4 + $0x20] sm:$0xff]  ;;  %v451_v35 = vld [vmem:[%s1259_s4 + $0x50] sm:$0xff]  ;;  %vm738_vm3 = vcmp.eq.s32.totalorder %v733_v3, %v1129_v20  ;;  %vm739_vm4 = vcmp.eq.s32.totalorder %v733_v3, %v731_v2  ;;  %vm735_vm5 = vcmp.gt.s32.totalorder %v733_v3, %v731_v2 }
   0x7   :  { %937 = vmatpush3.msra.mxu0 %v24_v4  ;;  %945 = vmatprep.subr.mxu1 %v110_v7  ;;  %v199_v23 = vrot.slane %v113_v22, %v198_v21  ;;  %v454_v32 = vld [vmem:[%s1259_s4 + $0x68] sm:$0xff]  ;;  %v453_v33 = vld [vmem:[%s1259_s4 + $0x60] sm:$0xff]  ;;  %v455_v46 = vld [vmem:[%s1259_s4 + $0x70] sm:$0xff]  ;;  %v1037_v4 = vmov 0.0   ;;  %vm734_vm6 = vcmp.gt.s32.totalorder %v733_v3, %v1129_v20 }
   0x8   :  { %939 = vmatmul.mubr.msk.f32.vlgmr.msra.gmra.mxu0 %vm27_vm0, %v23_v6  ;;  %946 = vmatpush3.msra.mxu1 %v110_v7  ;;  %v288_v36 = vld [vmem:[%s1259_s4 + $0x48] sm:$0xff]  ;;  %v540_v47 = vrot.slane %v455_v46, %v198_v21  ;;  %v622_v61 = vld [vmem:[%s1261_s1] sm:$0xff]  ;;  %v740_v5 = vsel %vm738_vm3, 1.0, %v1037_v4  ;;  %v741_v6 = vsel %vm739_vm4, 1.0, %v1037_v4 }
   0x9   :  { %947 = vmatprep.subr.mxu1 %v109_v8  ;;  %956 = vmatprep.mubr.msk.f32.mxu0 %vm200_vm2, %v1103_v11  ;;  %v373_v37 = vrot.slane %v288_v36, %v198_v21  ;;  %v623_v58 = vld [vmem:[%s1261_s1 + $0x8] sm:$0xff]  ;;  %v1009_v7 = vpack.i.bf16 %v741_v6, %v740_v5  ;;  %s1038_s1 = smov 16  }
   0xa   :  { %948 = vmatpush3.msra.mxu1 %v109_v8 }
   0xb   :  { %959 = vmatprep.subr.mxu1 %v287_v15  ;;  %1010 = vrot.lane.b32.xlu1 %v1009_v7, %s1038_s1 }
  0xc8   :  { %v940_v9 = vpop.f32.mrf.mxu0 }
  0xca   :  { %v100_v10 = vpop.f32.mrf.mxu0 }
  0xcb   :  { %949 = vmatprep.mubr.msk.f32.mxu1 %vm114_vm1, %v100_v10 }
  0xcc   :  { %950 = vmatmul.mubr.msk.f32.vlgmr.msra.gmra.mxu1 %vm114_vm1, %v940_v9 }
  0xcd   :  { %960 = vmatpush3.msra.mxu1 %v287_v15 }
  0xce   :  { %961 = vmatprep.subr.mxu1 %v286_v16 }
  0xcf   :  { %962 = vmatpush3.msra.mxu1 %v286_v16 }
  0xd0   :  { %963 = vmatprep.subr.mxu1 %v285_v17 }
  0xd1   :  { %964 = vmatpush3.msra.mxu1 %v285_v17 }
  0xd2   :  { %965 = vmatprep.subr.mxu1 %v284_v18 }
  0xd3   :  { %966 = vmatpush3.msra.mxu1 %v284_v18 }
 0x18c   :  { %v951_v12 = vpop.f32.mrf.mxu1 }
 0x18d   :  { %952 = vmatprep.subr.mxu0 %v951_v12 }
 0x18e   :  { %v187_v13 = vpop.f32.mrf.mxu1  ;;  %953 = vmatpush3.msra.mxu0 %v951_v12 }
 0x18f   :  { %954 = vmatprep.subr.mxu0 %v187_v13 }
 0x190   :  { %955 = vmatpush3.msra.mxu0 %v187_v13 }
 0x191   :  { %957 = vmatmul.mubr.msk.f32.vlgmr.msra.gmra.mxu0 %vm200_vm2, %v1110_v14 }
 0x192   :  { %974 = vmatprep.mubr.msk.f32.mxu0 %vm200_vm2, %v1103_v11 }
 0x251   :  { %v958_v24 = vpop.f32.mrf.mxu0 }
 0x252   :  { %v279_v25 = vadd.f32 %v958_v24, %v199_v23 }
 0x253   :  { %v273_v26 = vpop.f32.mrf.mxu0 }
 0x254   :  { %v274_v27 = vadd.f32 %v273_v26, %v199_v23  ;;  %v283_v29 = vmax.f32 %v279_v25, 0.0 }
 0x256   :  { %v282_v28 = vmax.f32 %v274_v27, 0.0 }
 0x258   :  { %967 = vmatprep.mubr.msk.f32.mxu1 %vm114_vm1, %v282_v28 }
 0x259   :  { %968 = vmatmul.mubr.msk.f32.vlgmr.msra.gmra.mxu1 %vm114_vm1, %v283_v29 }
 0x319   :  { %v969_v30 = vpop.f32.mrf.mxu1 }
 0x31a   :  { %970 = vmatprep.subr.mxu0 %v969_v30 }
 0x31b   :  { %v361_v31 = vpop.f32.mrf.mxu1  ;;  %971 = vmatpush3.msra.mxu0 %v969_v30 }
 0x31c   :  { %972 = vmatprep.subr.mxu0 %v361_v31 }
 0x31d   :  { %973 = vmatpush3.msra.mxu0 %v361_v31 }
 0x31e   :  { %975 = vmatmul.mubr.msk.f32.vlgmr.msra.gmra.mxu0 %vm200_vm2, %v1110_v14  ;;  %977 = vmatprep.subr.mxu0 %v454_v32 }
 0x31f   :  { %978 = vmatpush3.msra.mxu0 %v454_v32 }
 0x320   :  { %979 = vmatprep.subr.mxu0 %v453_v33 }
 0x321   :  { %980 = vmatpush3.msra.mxu0 %v453_v33 }
 0x322   :  { %981 = vmatprep.subr.mxu0 %v452_v34 }
 0x323   :  { %982 = vmatpush3.msra.mxu0 %v452_v34 }
 0x324   :  { %983 = vmatprep.subr.mxu0 %v451_v35 }
 0x325   :  { %984 = vmatpush3.msra.mxu0 %v451_v35 }
 0x3de   :  { %v976_v38 = vpop.f32.mrf.mxu0 }
 0x3df   :  { %v446_v39 = vadd.f32 %v976_v38, %v373_v37  ;;  %v1011_v38 = vpop.permute.xlu1 %1010 }
 0x3e0   :  { %v440_v40 = vpop.f32.mrf.mxu0 }
 0x3e1   :  { %v441_v41 = vadd.f32 %v440_v40, %v373_v37  ;;  %v450_v43 = vmax.f32 %v446_v39, 0.0  ;;  %v1034_v39 = vadd.high.f32.bf16 %v1110_v14, %v1011_v38 }
 0x3e3   :  { %v449_v42 = vmax.f32 %v441_v41, 0.0  ;;  %v1035_v41 = vadd.low.f32.bf16 %v1103_v11, %v1011_v38 }
 0x3e5   :  { %985 = vmatprep.mubr.msk.f32.mxu0 %vm114_vm1, %v449_v42  ;;  %v777_v42 = vsub.f32 1.0, %v1034_v39 }
 0x3e6   :  { %986 = vmatmul.mubr.msk.f32.vlgmr.msra.gmra.mxu0 %vm114_vm1, %v450_v43 }
 0x3e7   :  { %992 = vmatprep.mubr.msk.f32.mxu0 %vm200_vm2, %v1103_v11 }
 0x4a6   :  { %v987_v44 = vpop.f32.mrf.mxu0 }
 0x4a7   :  { %988 = vmatprep.subr.mxu0 %v987_v44 }
 0x4a8   :  { %v528_v45 = vpop.f32.mrf.mxu0  ;;  %989 = vmatpush3.msra.mxu0 %v987_v44 }
 0x4a9   :  { %990 = vmatprep.subr.mxu0 %v528_v45 }
 0x4aa   :  { %991 = vmatpush3.msra.mxu0 %v528_v45 }
 0x4ab   :  { %993 = vmatmul.mubr.msk.f32.vlgmr.msra.gmra.mxu0 %vm200_vm2, %v1110_v14 }
 0x56b   :  { %v994_v48 = vpop.f32.mrf.mxu0 }
 0x56c   :  { %v613_v49 = vadd.f32 %v994_v48, %v540_v47  ;;  %v776_v48 = vsub.f32 1.0, %v1035_v41 }
 0x56d   :  { %v607_v50 = vpop.f32.mrf.mxu0 }
 0x56e   :  { %v1163_v51 = vmax.f32 %v613_v49, 0.0  ;;  %v608_v52 = vadd.f32 %v607_v50, %v540_v47 }
 0x570   :  { %v620_v53 = vmul.f32 1.442695, %v1163_v51  ;;  %v1166_v54 = vmax.f32 %v608_v52, 0.0  ;;  %v819_v36 = vmul.f32 %v1163_v51, %v1163_v51  ;;  %v815_v44 = vmul.f32 2.0, %v1163_v51 }
 0x572   :  { %1014 = vpow2.f32 %v620_v53  ;;  %v618_v55 = vmul.f32 1.442695, %v1166_v54  ;;  %v818_v37 = vmul.f32 %v1166_v54, %v1166_v54  ;;  %v814_v49 = vmul.f32 2.0, %v1166_v54 }
 0x574   :  { %1016 = vpow2.f32 %v618_v55  ;;  %v816_v11 = vadd.f32 1.0, %v814_v49 }
 0x57f   :  { %v1169_v56 = vpop.eup %1014 }
 0x580   :  { %628 = vrot.lane.b32.xlu0 %v1169_v56, %s1036_s8 }
 0x581   :  { %v1173_v57 = vpop.eup %1016 }
 0x584   :  { %626 = vrot.lane.b32.xlu0 %v1173_v57, %s1036_s8 }
 0x5f2   :  { %v629_v59 = vpop.permute.xlu0 %628 }
 0x5f3   :  { %v633_v60 = vmul.f32 %v629_v59, %v623_v58  ;;  %v817_v58 = vadd.f32 1.0, %v815_v44 }
 0x5f5   :  { %v1184_v62 = vadd.f32 %v633_v60, %v1163_v51  ;;  %v831_v51 = vmul.f32 %v1169_v56, %v1169_v56 }
 0x5f6   :  { %v627_v63 = vpop.permute.xlu0 %626 }
 0x5f7   :  { %v632_v0 = vmul.f32 %v627_v63, %v622_v61  ;;  %995 = vmatprep.subr.msk.mxu1 %vm200_vm2, %v1184_v62 }
 0x5f8   :  { %996 = vmatpush3.xpose.msk.msra.mxu1 %vm200_vm2, %v1184_v62 }
 0x5f9   :  { %v1191_v1 = vadd.f32 %v632_v0, %v1166_v54  ;;  %v830_v54 = vmul.f32 %v1173_v57, %v1173_v57 }
 0x5fb   :  { %997 = vmatprep.subr.msk.mxu1 %vm200_vm2, %v1191_v1  ;;  %999 = vmatprep.mubr.msk.f32.mxu1 %vm200_vm2, %v1191_v1 }
 0x5fc   :  { %998 = vmatpush3.xpose.msk.msra.mxu1 %vm200_vm2, %v1191_v1 }
 0x5ff   :  { %1000 = vmatmul.mubr.msk.f32.vlgmr.msra.gmra.mxu1 %vm200_vm2, %v1184_v62 }
 0x6bf   :  { %v1001_v8 = vpop.f32.mrf.mxu1 }
 0x6c0   :  { %v892_v9 = vmul.f32 -1.442695, %v1001_v8 }
 0x6c1   :  { %v708_v10 = vpop.f32.mrf.mxu1 }
 0x6c2   :  { %1018 = vpow2.f32 %v892_v9  ;;  %v891_v12 = vmul.f32 -1.442695, %v708_v10 }
 0x6c4   :  { %1020 = vpow2.f32 %v891_v12 }
 0x6cf   :  { %v1019_v13 = vpop.eup %1018 }
 0x6d0   :  { %v724_v15 = vadd.f32 1.0, %v1019_v13 }
 0x6d1   :  { %v1021_v16 = vpop.eup %1020 }
 0x6d2   :  { %1022 = vrcp.f32 %v724_v15  ;;  %v723_v17 = vadd.f32 1.0, %v1021_v16 }
 0x6d4   :  { %1024 = vrcp.f32 %v723_v17 }
 0x6df   :  { %v1023_v18 = vpop.eup %1022 }
 0x6e0   :  { %v1207_v19 = vsel %vm735_vm5, %v1023_v18, 0.0 }
 0x6e1   :  { %v1025_v21 = vpop.eup %1024  ;;  %1026 = vlog2.f32 %v1207_v19  ;;  %v759_v22 = vsub.f32 1.0, %v1207_v19 }
 0x6e2   :  { %v1211_v23 = vsel %vm734_vm6, %v1025_v21, 0.0 }
 0x6e3   :  { %1028 = vlog2.f32 %v1211_v23  ;;  %v758_v24 = vsub.f32 1.0, %v1211_v23 }
 0x6e4   :  { %1030 = vlog2.f32 %v759_v22 }
 0x6e5   :  { %1032 = vlog2.f32 %v758_v24 }
 0x6ee   :  { %v1027_v25 = vpop.eup %1026 }
 0x6ef   :  { %v755_v26 = vmul.f32 0.6931472, %v1027_v25 }
 0x6f0   :  { %v1029_v27 = vpop.eup %1028 }
 0x6f1   :  { %v1031_v20 = vpop.eup %1030  ;;  %v757_v28 = vmax.f32 %v755_v26, -100.0  ;;  %v753_v29 = vmul.f32 0.6931472, %v1029_v27 }
 0x6f2   :  { %v1033_v30 = vpop.eup %1032  ;;  %v763_v31 = vmul.f32 0.6931472, %v1031_v20 }
 0x6f3   :  { %770 = vrot.lane.b32.xlu0 %v757_v28, %s1038_s1  ;;  %v756_v32 = vmax.f32 %v753_v29, -100.0  ;;  %v761_v33 = vmul.f32 0.6931472, %v1033_v30 }
 0x6f4   :  { %v765_v34 = vmax.f32 %v763_v31, -100.0 }
 0x6f5   :  { %768 = vrot.lane.b32.xlu1 %v756_v32, %s1038_s1  ;;  %v764_v35 = vmax.f32 %v761_v33, -100.0 }
 0x6f7   :  { %782 = vrot.lane.b32.xlu0 %v765_v34, %s1038_s1 }
 0x6f9   :  { %780 = vrot.lane.b32.xlu1 %v764_v35, %s1038_s1 }
 0x6fb   :  { %824 = vrot.lane.b32.xlu0 %v819_v36, %s1038_s1 }
 0x6fd   :  { %822 = vrot.lane.b32.xlu1 %v818_v37, %s1038_s1 }
 0x765   :  { %v771_v40 = vpop.permute.xlu0 %770 }
 0x766   :  { %v775_v46 = vmul.f32 %v1034_v39, %v771_v40 }
 0x767   :  { %v769_v43 = vpop.permute.xlu1 %768 }
 0x768   :  { %v774_v52 = vmul.f32 %v1035_v41, %v769_v43 }
 0x769   :  { %v783_v45 = vpop.permute.xlu0 %782 }
 0x76a   :  { %v787_v47 = vmul.f32 %v783_v45, %v777_v42 }
 0x76b   :  { %v781_v50 = vpop.permute.xlu1 %780 }
 0x76c   :  { %v789_v53 = vadd.f32 %v787_v47, %v775_v46  ;;  %v786_v55 = vmul.f32 %v781_v50, %v776_v48 }
 0x76d   :  { %v825_v59 = vpop.permute.xlu0 %824 }
 0x76e   :  { %v791_v14 = vsub.f32 0.0, %v789_v53  ;;  %v788_v60 = vadd.f32 %v786_v55, %v774_v52  ;;  %v829_v61 = vsub.f32 %v817_v58, %v825_v59 }
 0x76f   :  { %v823_v63 = vpop.permute.xlu1 %822 }
 0x770   :  { %v790_v0 = vsub.f32 0.0, %v788_v60  ;;  %v828_v2 = vsub.f32 %v816_v11, %v823_v63  ;;  %796 = vrot.lane.b32.xlu0 %v791_v14, %s1036_s8  ;;  %v833_v3 = vsub.f32 %v829_v61, %v831_v51 }
 0x772   :  { %794 = vrot.lane.b32.xlu1 %v790_v0, %s1036_s8  ;;  %v832_v4 = vsub.f32 %v828_v2, %v830_v54 }
 0x774   :  { %838 = vrot.lane.b32.xlu0 %v833_v3, %s1036_s8 }
 0x776   :  { %836 = vrot.lane.b32.xlu1 %v832_v4, %s1036_s8 }
 0x7e2   :  { %v797_v5 = vpop.permute.xlu0 %796 }
 0x7e3   :  { %v801_v7 = vsel %vm200_vm2, %v797_v5, 0.0 }
 0x7e4   :  { %v795_v6 = vpop.permute.xlu1 %794 }
 0x7e5   :  { %v800_v56 = vsel %vm200_vm2, %v795_v6, 0.0 }
 0x7e6   :  { %v839_v8 = vpop.permute.xlu0 %838  ;;  %v802_v9 = vadd.f32 %v801_v7, %v800_v56 }
 0x7e7   :  { %v843_v12 = vsel %vm200_vm2, %v839_v8, 0.0 }
 0x7e8   :  { %803 = vadd.xlane.f32.xlu1 %v802_v9  ;;  %v837_v10 = vpop.permute.xlu1 %836 }
 0x7e9   :  { %v842_v57 = vsel %vm200_vm2, %v837_v10, 0.0 }
 0x7ea   :  { %v844_v13 = vadd.f32 %v843_v12, %v842_v57 }
 0x7ec   :  { %845 = vadd.xlane.f32.xlu0 %v844_v13 }
 0x7f9   :  { %859 = vrot.lane.b32.xlu1 %v1184_v62, %s1038_s1 }
 0x802   :  { %857 = vrot.lane.b32.xlu0 %v1191_v1, %s1038_s1 }
 0x871   :  { %v804_v15 = vpop.xlane.xlu1 %803 }
 0x872   :  { %v805_v16 = vrot.slane %v804_v15, 4 }
 0x874   :  { %v806_v17 = vadd.f32 %v805_v16, %v804_v15 }
 0x875   :  { %v846_v18 = vpop.xlane.xlu0 %845  ;;  %v860_v31 = vpop.permute.xlu1 %859 }
 0x876   :  { %v807_v21 = vrot.slane %v806_v17, 2  ;;  %v847_v22 = vrot.slane %v846_v18, 4  ;;  %v864_v36 = vsel %vm200_vm2, %v1207_v19, %v860_v31 }
 0x878   :  { %v848_v24 = vadd.f32 %v847_v22, %v846_v18  ;;  %v808_v25 = vadd.f32 %v807_v21, %v806_v17 }
 0x879   :  { %v858_v32 = vpop.permute.xlu0 %857 }
 0x87a   :  { %v849_v26 = vrot.slane %v848_v24, 2  ;;  %v809_v27 = vrot.slane %v808_v25, 1  ;;  %v863_v37 = vsel %vm200_vm2, %v1211_v23, %v858_v32 }
 0x87c   :  { %v810_v20 = vadd.f32 %v809_v27, %v808_v25  ;;  %v850_v28 = vadd.f32 %v849_v26, %v848_v24 }
 0x87e   :  { %1002 = vpush %v810_v20  ;;  %v851_v29 = vrot.slane %v850_v28, 1 }
 0x880   :  { %v852_v30 = vadd.f32 %v851_v29, %v850_v28 }
 0x882   :  { %1004 = vpush %v852_v30 }
 0x8af   :  { %s1003_s11 = spop %1002 }
 0x8b0   :  { %v812_v62 = vstv %s1003_s11 }
 0x8b1   :  { %v813_v33 = vmul.f32 0.00390625, %v812_v62 }
 0x8b3   :  { %s1005_s12 = spop %1004 }
 0x8b4   :  { %v854_v1 = vstv %s1005_s12 }
 0x8b5   :  { %v855_v34 = vmul.f32 0.001953125, %v854_v1 }
 0x8b7   :  { %v856_v35 = vadd.f32 %v855_v34, %v813_v33 }
 0x8b9   :  { %v865_v38 = vsel %vm114_vm1, %v863_v37, %v856_v35  ;;  %v866_v39 = vsel %vm114_vm1, %v864_v36, %v856_v35 }
 0x8ba   :  { %867 = vst [vmem:[%s1262_s5] sm:$0xff] %v865_v38  ;;  %868 = vst [vmem:[%s1262_s5 + $0x8] sm:$0xff] %v866_v39 }

</bundles_post_ra>
